<compile_context>
chip_gen: v6e
topology: v6e:2x2x1
jax: 0.10.0
libtpu: 0.0.40
codegen_flags: <defaults>
</compile_context>

<pallas_src>
import functools

import jax
import jax.numpy as jnp
from jax import lax
from jax.experimental import pallas as pl
from jax.experimental.pallas import tpu as pltpu


_TARGET_STEP_BYTES = 4 * 1024 * 1024    # ~4 MiB of fresh HBM per grid step
_INPUT_VMEM_BUDGET = 16 * 1024 * 1024   # cap for double-buffered input blocks
_VMEM_LIMIT_BYTES = 32 * 1024 * 1024    # scoped VMEM limit (safe on v5e/v6e/v7x)


def _dice_sums_kernel(x_ref, t_ref, sx_ref, sxt_ref, *, hw, tile, lanes):
    """grid = (spatial_split [par], batch_blocks [par], spatial_tiles [arbitrary]).

    Emits per-sample partial sums (sum(x), sum(x*t)) per spatial split into
    lane-dense f32 output blocks resident across the reduction axis.
    """
    p = pl.program_id(0)
    j = pl.program_id(2)
    tps = pl.num_programs(2)

    @pl.when(j == 0)
    def _init():
        sx_ref[...] = jnp.zeros_like(sx_ref)
        sxt_ref[...] = jnp.zeros_like(sxt_ref)

    nb = x_ref.shape[0]
    n_slices = tile // lanes
    # Logical (unclamped) first column of this block.  The index_map clamps the
    # DMA to stay in-bounds, so fully out-of-range blocks re-read valid data and
    # are zeroed out entirely by the mask below.
    col0 = (p * tps + j) * tile

    def accumulate(masked):
        if masked:
            lane_iota = lax.broadcasted_iota(jnp.int32, (nb, lanes), 1)

        def slice_terms(xv, mv, start):
            # Tail columns (>= hw) hold undefined data: mask BOTH x and the
            # target mask so neither corrupts the sums.
            if masked:
                valid = (col0 + start + lane_iota) < hw
                xv = jnp.where(valid, xv, 0.0)
                mv = jnp.where(valid, mv, 0.0)
            return xv, xv * mv

        if n_slices == 1:
            xv = x_ref[...].astype(jnp.float32)
            # Contract 0 <= target <= 1: the class-1 one-hot is target itself.
            mv = t_ref[...].astype(jnp.float32)
            ax, axt = slice_terms(xv, mv, 0)
        else:
            def body(s, carry):
                ax, axt = carry
                start = pl.multiple_of(s * lanes, lanes)
                xv = x_ref[:, pl.ds(start, lanes)].astype(jnp.float32)
                mv = t_ref[:, pl.ds(start, lanes)].astype(jnp.float32)
                dx, dxt = slice_terms(xv, mv, start)
                return ax + dx, axt + dxt

            zeros = jnp.zeros((nb, lanes), jnp.float32)
            ax, axt = lax.fori_loop(0, n_slices, body, (zeros, zeros),
                                    unroll=min(8, n_slices))

        # Single VMEM read-modify-write per grid step; the output block acts as
        # the cross-step accumulator (same block index across the j axis).
        sx_ref[0] += ax
        sxt_ref[0] += axt

    @pl.when(col0 + tile <= hw)
    def _interior():
        accumulate(masked=False)

    @pl.when(col0 + tile > hw)
    def _edge():
        accumulate(masked=True)


def dice_coefficient_score(inp, target, eps=1e-6, block_cols=None):
    """inp: (N, 1, H, W) float; target: (N, H, W) int with values in {0, 1}."""
    if inp.ndim != 4:
        raise ValueError(f"Invalid input shape, expected (N,1,H,W). Got {inp.shape}")
    n, c, h, w = inp.shape
    if c != 1:
        raise ValueError(f"Expected a single prediction channel, got C={c}")
    if inp.shape[-2:] != target.shape[-2:]:
        raise ValueError(
            f"input and target spatial shapes differ: {inp.shape} vs {target.shape}")

    # Narrow >32-bit dtypes (only reachable with x64 enabled); normally a no-op.
    if jnp.dtype(inp.dtype).itemsize > 4:
        inp = inp.astype(jnp.float32)
    if jnp.dtype(target.dtype).itemsize > 4:
        target = target.astype(jnp.int32)

    hw = h * w
    # Views only: no pad, no dtype cast -> no extra HBM traffic in the wrapper.
    x = inp.reshape(n, hw)
    t = target.reshape(n, hw)

    # Batch blocking: rows of 8.  A partial last block's garbage rows never mix
    # across rows and their output rows are dropped on writeback.
    nb = n if n <= 8 else 8
    nbb = pl.cdiv(n, nb)

    itemsize = jnp.dtype(x.dtype).itemsize + jnp.dtype(t.dtype).itemsize

    if hw < 128:
        tile = hw                        # block == full (ragged) lane extent
    else:
        max_cols = (hw // 128) * 128     # keep blocks inside the array; the
                                         # ragged tail is masked in-kernel
        desired = (_TARGET_STEP_BYTES // (nb * itemsize)
                   if block_cols is None else block_cols)
        desired = max(128, (desired // 128) * 128)
        vmem_cap = max(128, (_INPUT_VMEM_BUDGET // (2 * nb * itemsize) // 128) * 128)
        tile = min(desired, max_cols, vmem_cap)
    lanes = tile if tile < 128 else (
        512 if tile % 512 == 0 else 256 if tile % 256 == 0 else 128)

    total_tiles = pl.cdiv(hw, tile)
    # Leading parallel spatial split: >= 2 programs on a parallel axis so both
    # v7x TensorCores get work even when there is a single batch block.
    p_split = 2 if total_tiles >= 2 else 1
    tps = pl.cdiv(total_tiles, p_split)

    def in_map(p, b, j):
        # Clamp so the DMA never walks past the last valid column block; the
        # kernel masks clamped duplicates to zero via the logical column index.
        return (b, jnp.minimum(p * tps + j, total_tiles - 1))

    def out_map(p, b, j):
        return (p, b, 0)

    sum_x, sum_xt = pl.pallas_call(
        functools.partial(_dice_sums_kernel, hw=hw, tile=tile, lanes=lanes),
        out_shape=(
            jax.ShapeDtypeStruct((p_split, n, lanes), jnp.float32),
            jax.ShapeDtypeStruct((p_split, n, lanes), jnp.float32),
        ),
        grid_spec=pltpu.PrefetchScalarGridSpec(
            num_scalar_prefetch=0,
            grid=(p_split, nbb, tps),
            in_specs=[
                pl.BlockSpec((nb, tile), in_map),   # x (native float dtype)
                pl.BlockSpec((nb, tile), in_map),   # target (native int dtype)
            ],
            out_specs=[
                pl.BlockSpec((1, nb, lanes), out_map),
                pl.BlockSpec((1, nb, lanes), out_map),
            ],
        ),
        compiler_params=pltpu.CompilerParams(
            dimension_semantics=("parallel", "parallel", "arbitrary"),
            vmem_limit_bytes=_VMEM_LIMIT_BYTES,
        ),
    )(x, t)

    # Tiny epilogue in the wrapper: combine spatial splits + lanes, then dice.
    sx = jnp.sum(sum_x, axis=(0, 2))       # per-sample sum(x)
    inter = jnp.sum(sum_xt, axis=(0, 2))   # per-sample sum(x * 1[t == 1])
    # For t in {0,1}: the zero channel contributes nothing and the one-hot sums
    # to exactly 1 per pixel, so cardinality = sum(x) + H*W.
    card = sx + float(hw)
    dice = 2.0 * inter / (card + eps)
    return jnp.mean(dice)


def _reference(x, t, eps=1e-6):
    """Pure-JAX mirror of the torch forward."""
    xs = x[:, 0]                                                   # (N, H, W)
    input_sig = jnp.stack([jnp.zeros_like(xs), xs], axis=1)        # (N, 2, H, W)
    one_hot = jax.nn.one_hot(t, 2, axis=1, dtype=x.dtype)          # (N, 2, H, W)
    inter = jnp.sum(input_sig * one_hot, axis=(1, 2, 3))
    card = jnp.sum(input_sig + one_hot, axis=(1, 2, 3))
    return jnp.mean(2.0 * inter / (card + eps))


if __name__ == "__main__":
    key = jax.random.PRNGKey(0)

    # Tiny configs chosen to exercise every kernel path: 2-way spatial split,
    # clamped duplicate block, ragged-tail masking, partial batch block,
    # multi-step reduction revisit, and the inner fori_loop over lane slices.
    cases = [
        (2, 16, 24, 128),    # 3 tiles -> P=2 split + fully-masked clamped block
        (3, 17, 17, None),   # H*W=289 -> ragged tail masking, odd small N
        (10, 12, 12, None),  # N>8, N%8!=0 -> partial batch block
        (2, 32, 32, 256),    # 2 reduction steps per output block (revisit path)
        (2, 32, 32, None),   # single block, inner fori_loop over lane slices
    ]

    all_ok = True
    for (N, H, W, bc) in cases:
        key, kx, kt = jax.random.split(key, 3)
        x = jax.random.uniform(kx, (N, 1, H, W), dtype=jnp.float32)
        t = jax.random.randint(kt, (N, H, W), 0, 2, dtype=jnp.int32)
        out = jax.block_until_ready(dice_coefficient_score(x, t, block_cols=bc))
        ref = _reference(x, t)
        ok = bool(jnp.allclose(out, ref, rtol=1e-5, atol=1e-6))
        all_ok = all_ok and ok
        if not ok:
            print(f"MISMATCH N={N} H={H} W={W} block_cols={bc}: {out} vs {ref}")

    assert all_ok
    print("KERNEL_OK")
</pallas_src>

<mosaic_0001>
module attributes {stable_mosaic.version = 11 : i64} {
  func.func @_dice_sums_kernel(%arg0: i32, %arg1: i32, %arg2: i32, %arg3: memref<2x128xf32, #tpu.memory_space<vmem>>, %arg4: memref<2x128xi32, #tpu.memory_space<vmem>>, %arg5: memref<1x2x128xf32, #tpu.memory_space<vmem>>, %arg6: memref<1x2x128xf32, #tpu.memory_space<vmem>>) attributes {dimension_semantics = [#tpu.dimension_semantics<parallel>, #tpu.dimension_semantics<parallel>, #tpu.dimension_semantics<arbitrary>], iteration_bounds = array<i64: 2, 1, 2>, scalar_prefetch = 0 : i64, scratch_operands = 0 : i64, tpu.core_type = #tpu.core_type<tc>, window_params = [{transform_indices = @transform_0, window_bounds = array<i64: 2, 128>}, {transform_indices = @transform_1, window_bounds = array<i64: 2, 128>}, {transform_indices = @transform_2, window_bounds = array<i64: 1, 2, 128>}, {transform_indices = @transform_3, window_bounds = array<i64: 1, 2, 128>}]} {
    %c0_i32 = arith.constant 0 : i32
    %0 = arith.cmpi eq, %arg2, %c0_i32 : i32
    %1 = arith.extui %0 : i1 to i32
    %c0_i32_0 = arith.constant 0 : i32
    %2 = arith.cmpi ne, %1, %c0_i32_0 : i32
    scf.if %2 {
      %cst = arith.constant 0.000000e+00 : f32
      %14 = vector.broadcast %cst : f32 to vector<1x2x128xf32>
      %c0 = arith.constant 0 : index
      %c0_6 = arith.constant 0 : index
      %c0_7 = arith.constant 0 : index
      %15 = vector.load %arg5[%c0, %c0_6, %c0_7] : memref<1x2x128xf32, #tpu.memory_space<vmem>>, vector<1x2x128xf32>
      tpu.vector_store %arg5[%c0, %c0_6, %c0_7], %14 {strides = array<i32>} : memref<1x2x128xf32, #tpu.memory_space<vmem>>, vector<1x2x128xf32>,
      %cst_8 = arith.constant 0.000000e+00 : f32
      %16 = vector.broadcast %cst_8 : f32 to vector<1x2x128xf32>
      %c0_9 = arith.constant 0 : index
      %c0_10 = arith.constant 0 : index
      %c0_11 = arith.constant 0 : index
      %17 = vector.load %arg6[%c0_9, %c0_10, %c0_11] : memref<1x2x128xf32, #tpu.memory_space<vmem>>, vector<1x2x128xf32>
      tpu.vector_store %arg6[%c0_9, %c0_10, %c0_11], %16 {strides = array<i32>} : memref<1x2x128xf32, #tpu.memory_space<vmem>>, vector<1x2x128xf32>,
    } else {
    }
    %c2_i32 = arith.constant 2 : i32
    %3 = arith.muli %arg0, %c2_i32 : i32
    %4 = arith.addi %3, %arg2 : i32
    %c128_i32 = arith.constant 128 : i32
    %5 = arith.muli %4, %c128_i32 : i32
    %c128_i32_1 = arith.constant 128 : i32
    %6 = arith.addi %5, %c128_i32_1 : i32
    %c384_i32 = arith.constant 384 : i32
    %7 = arith.cmpi sle, %6, %c384_i32 : i32
    %8 = arith.extui %7 : i1 to i32
    %c0_i32_2 = arith.constant 0 : i32
    %9 = arith.cmpi ne, %8, %c0_i32_2 : i32
    scf.if %9 {
      %c0 = arith.constant 0 : index
      %c0_6 = arith.constant 0 : index
      %14 = vector.load %arg3[%c0, %c0_6] : memref<2x128xf32, #tpu.memory_space<vmem>>, vector<2x128xf32>
      %c0_7 = arith.constant 0 : index
      %c0_8 = arith.constant 0 : index
      %15 = vector.load %arg4[%c0_7, %c0_8] : memref<2x128xi32, #tpu.memory_space<vmem>>, vector<2x128xi32>
      %16 = arith.sitofp %15 : vector<2x128xi32> to vector<2x128xf32>
      %17 = arith.mulf %14, %16 : vector<2x128xf32>
      %c0_9 = arith.constant 0 : index
      %c0_10 = arith.constant 0 : index
      %c0_11 = arith.constant 0 : index
      %18 = vector.load %arg5[%c0_9, %c0_10, %c0_11] : memref<1x2x128xf32, #tpu.memory_space<vmem>>, vector<1x2x128xf32>
      %19 = vector.shape_cast %18 : vector<1x2x128xf32> to vector<2x128xf32>
      %20 = arith.addf %19, %14 : vector<2x128xf32>
      %c0_12 = arith.constant 0 : index
      %c0_13 = arith.constant 0 : index
      %c0_14 = arith.constant 0 : index
      %21 = vector.load %arg5[%c0_12, %c0_13, %c0_14] : memref<1x2x128xf32, #tpu.memory_space<vmem>>, vector<1x2x128xf32>
      %22 = vector.shape_cast %21 : vector<1x2x128xf32> to vector<2x128xf32>
      %23 = vector.shape_cast %20 : vector<2x128xf32> to vector<1x2x128xf32>
      tpu.vector_store %arg5[%c0_12, %c0_13, %c0_14], %23 {strides = array<i32>} : memref<1x2x128xf32, #tpu.memory_space<vmem>>, vector<1x2x128xf32>,
      %c0_15 = arith.constant 0 : index
      %c0_16 = arith.constant 0 : index
      %c0_17 = arith.constant 0 : index
      %24 = vector.load %arg6[%c0_15, %c0_16, %c0_17] : memref<1x2x128xf32, #tpu.memory_space<vmem>>, vector<1x2x128xf32>
      %25 = vector.shape_cast %24 : vector<1x2x128xf32> to vector<2x128xf32>
      %26 = arith.addf %25, %17 : vector<2x128xf32>
      %c0_18 = arith.constant 0 : index
      %c0_19 = arith.constant 0 : index
      %c0_20 = arith.constant 0 : index
      %27 = vector.load %arg6[%c0_18, %c0_19, %c0_20] : memref<1x2x128xf32, #tpu.memory_space<vmem>>, vector<1x2x128xf32>
      %28 = vector.shape_cast %27 : vector<1x2x128xf32> to vector<2x128xf32>
      %29 = vector.shape_cast %26 : vector<2x128xf32> to vector<1x2x128xf32>
      tpu.vector_store %arg6[%c0_18, %c0_19, %c0_20], %29 {strides = array<i32>} : memref<1x2x128xf32, #tpu.memory_space<vmem>>, vector<1x2x128xf32>,
    } else {
    }
    %c128_i32_3 = arith.constant 128 : i32
    %10 = arith.addi %5, %c128_i32_3 : i32
    %c384_i32_4 = arith.constant 384 : i32
    %11 = arith.cmpi sgt, %10, %c384_i32_4 : i32
    %12 = arith.extui %11 : i1 to i32
    %c0_i32_5 = arith.constant 0 : i32
    %13 = arith.cmpi ne, %12, %c0_i32_5 : i32
    scf.if %13 {
      %14 = tpu.iota {dimensions = array<i32: 1>} : vector<2x128xi32>
      %c0 = arith.constant 0 : index
      %c0_6 = arith.constant 0 : index
      %15 = vector.load %arg3[%c0, %c0_6] : memref<2x128xf32, #tpu.memory_space<vmem>>, vector<2x128xf32>
      %c0_7 = arith.constant 0 : index
      %c0_8 = arith.constant 0 : index
      %16 = vector.load %arg4[%c0_7, %c0_8] : memref<2x128xi32, #tpu.memory_space<vmem>>, vector<2x128xi32>
      %17 = arith.sitofp %16 : vector<2x128xi32> to vector<2x128xf32>
      %c0_i32_9 = arith.constant 0 : i32
      %18 = arith.addi %5, %c0_i32_9 : i32
      %19 = vector.broadcast %18 : i32 to vector<2x128xi32>
      %20 = arith.addi %19, %14 : vector<2x128xi32>
      %c384_i32_10 = arith.constant 384 : i32
      %21 = vector.broadcast %c384_i32_10 : i32 to vector<2x128xi32>
      %22 = arith.cmpi slt, %20, %21 : vector<2x128xi32>
      %cst = arith.constant 0.000000e+00 : f32
      %23 = vector.broadcast %cst : f32 to vector<2x128xf32>
      %24 = arith.select %22, %15, %23 : vector<2x128xi1>, vector<2x128xf32>
      %cst_11 = arith.constant 0.000000e+00 : f32
      %25 = vector.broadcast %cst_11 : f32 to vector<2x128xf32>
      %26 = arith.select %22, %17, %25 : vector<2x128xi1>, vector<2x128xf32>
      %27 = arith.mulf %24, %26 : vector<2x128xf32>
      %c0_12 = arith.constant 0 : index
      %c0_13 = arith.constant 0 : index
      %c0_14 = arith.constant 0 : index
      %28 = vector.load %arg5[%c0_12, %c0_13, %c0_14] : memref<1x2x128xf32, #tpu.memory_space<vmem>>, vector<1x2x128xf32>
      %29 = vector.shape_cast %28 : vector<1x2x128xf32> to vector<2x128xf32>
      %30 = arith.addf %29, %24 : vector<2x128xf32>
      %c0_15 = arith.constant 0 : index
      %c0_16 = arith.constant 0 : index
      %c0_17 = arith.constant 0 : index
      %31 = vector.load %arg5[%c0_15, %c0_16, %c0_17] : memref<1x2x128xf32, #tpu.memory_space<vmem>>, vector<1x2x128xf32>
      %32 = vector.shape_cast %31 : vector<1x2x128xf32> to vector<2x128xf32>
      %33 = vector.shape_cast %30 : vector<2x128xf32> to vector<1x2x128xf32>
      tpu.vector_store %arg5[%c0_15, %c0_16, %c0_17], %33 {strides = array<i32>} : memref<1x2x128xf32, #tpu.memory_space<vmem>>, vector<1x2x128xf32>,
      %c0_18 = arith.constant 0 : index
      %c0_19 = arith.constant 0 : index
      %c0_20 = arith.constant 0 : index
      %34 = vector.load %arg6[%c0_18, %c0_19, %c0_20] : memref<1x2x128xf32, #tpu.memory_space<vmem>>, vector<1x2x128xf32>
      %35 = vector.shape_cast %34 : vector<1x2x128xf32> to vector<2x128xf32>
      %36 = arith.addf %35, %27 : vector<2x128xf32>
      %c0_21 = arith.constant 0 : index
      %c0_22 = arith.constant 0 : index
      %c0_23 = arith.constant 0 : index
      %37 = vector.load %arg6[%c0_21, %c0_22, %c0_23] : memref<1x2x128xf32, #tpu.memory_space<vmem>>, vector<1x2x128xf32>
      %38 = vector.shape_cast %37 : vector<1x2x128xf32> to vector<2x128xf32>
      %39 = vector.shape_cast %36 : vector<2x128xf32> to vector<1x2x128xf32>
      tpu.vector_store %arg6[%c0_21, %c0_22, %c0_23], %39 {strides = array<i32>} : memref<1x2x128xf32, #tpu.memory_space<vmem>>, vector<1x2x128xf32>,
    } else {
    }
    return
  }
  func.func @transform_0(%arg0: i32, %arg1: i32, %arg2: i32) -> (i32, i32) {
    %c2_i32 = arith.constant 2 : i32
    %0 = arith.muli %arg0, %c2_i32 : i32
    %1 = arith.addi %0, %arg2 : i32
    %c2_i32_0 = arith.constant 2 : i32
    %2 = arith.minsi %1, %c2_i32_0 : i32
    %c0_i32 = arith.constant 0 : i32
    return %arg1, %2 : i32, i32
  }
  func.func @transform_1(%arg0: i32, %arg1: i32, %arg2: i32) -> (i32, i32) {
    %c2_i32 = arith.constant 2 : i32
    %0 = arith.muli %arg0, %c2_i32 : i32
    %1 = arith.addi %0, %arg2 : i32
    %c2_i32_0 = arith.constant 2 : i32
    %2 = arith.minsi %1, %c2_i32_0 : i32
    %c0_i32 = arith.constant 0 : i32
    return %arg1, %2 : i32, i32
  }
  func.func @transform_2(%arg0: i32, %arg1: i32, %arg2: i32) -> (i32, i32, i32) {
    %c0_i32 = arith.constant 0 : i32
    %c0_i32_0 = arith.constant 0 : i32
    return %arg0, %arg1, %c0_i32 : i32, i32, i32
  }
  func.func @transform_3(%arg0: i32, %arg1: i32, %arg2: i32) -> (i32, i32, i32) {
    %c0_i32 = arith.constant 0 : i32
    %c0_i32_0 = arith.constant 0 : i32
    return %arg0, %arg1, %c0_i32 : i32, i32, i32
  }
}

</mosaic_0001>

<bundles_post_ra>
// kernel: tpu_custom_call.1
= control target key start
LH: loop header
LB: loop body
LE: loop exit
PB: predicated region body
PF: predicated region fallthrough
CT: control target
= control target key end

     0   :  { %s1171_s0 = inlined_call_operand.hbm [shape: f32[2,384], index: 0, kind: input, shape index: {}]   ;;  %s1172_s1 = inlined_call_operand.hbm [shape: s32[2,384], index: 1, kind: input, shape index: {}]   ;;  %s1173_s2 = inlined_call_operand.hbm [shape: f32[2,2,128], index: 2, kind: output, shape index: {0}]   ;;  %s1174_s3 = inlined_call_operand.hbm [shape: f32[2,2,128], index: 3, kind: output, shape index: {1}]  }
   0x1   :  { %1179 = sst [smem:[#allocation18_spill]] %s1171_s0 }
   0x2   :  { %9 = vsyncpa [#allocation3], 0 }
   0x3   :  { %11 = vsyncpa [#allocation3 + $0x1], 0 }
   0x4   :  { %12 = vsyncpa [#allocation6], 0 }
   0x5   :  { %14 = vsyncpa [#allocation6 + $0x1], 0 }
   0x6   :  { %15 = vsyncpa [#allocation4], 0 }
   0x7   :  { %17 = vsyncpa [#allocation4 + $0x1], 0 }
   0x8   :  { %18 = vsyncpa [#allocation9], 0 }
   0x9   :  { %20 = vsyncpa [#allocation9 + $0x1], 0  ;;  %s901_s12 = smov 0   ;;  %s903_s13 = smov 0  }
   0xa   :  { %s905_s14 = smov 0   ;;  %s907_s15 = smov 0  }
   0xb   :  { %s909_s16 = smov 0   ;;  %s911_s17 = smov 0  }
   0xc   :  { %s913_s18 = smov 0   ;;  %s915_s19 = smov 0  }
   0xd   :  { %s917_s20 = smov 0   ;;  %s919_s21 = smov 0  }
   0xe   :  { %s921_s22 = smov 0  }
   0xf LB: > { %1180 = sst [smem:[#allocation14_spill]] %s866_s20  ;;  %s521_s23 = sadd.s32 4294967295, %s874_s22   ;;  %s874_s22 = sphi %s921_s22, %s26_s22   ;;  %s870_s21 = sphi %s919_s21, %s1194_s21   ;;  %s866_s20 = sphi %s917_s20, %s1193_s20   ;;  %s862_s19 = sphi %s915_s19, %s1192_s19   ;;  %s858_s18 = sphi %s913_s18, %s1191_s18   ;;  %s854_s17 = sphi %s911_s17, %s1200_s17   ;;  %s850_s16 = sphi %s909_s16, %s1199_s16   ;;  %s846_s15 = sphi %s907_s15, %s1198_s15   ;;  %s842_s14 = sphi %s905_s14, %s1197_s14   ;;  %s838_s13 = sphi %s903_s13, %s1196_s13   ;;  %s834_s12 = sphi %s901_s12, %s1195_s12  }
  0x10   : > { %1181 = sst [smem:[#allocation15_spill]] %s870_s21  ;;  %s522_s24 = sadd.s32 4294967294, %s874_s22  }
  0x11   : > { %s38_s25 = sadd.s32 1, %s866_s20  ;;  %s45_s26 = sadd.s32 1, %s870_s21 }
  0x12   : > { %p39_p0 = scmp.ge.s32.totalorder %s38_s25, 2  ;;  %s523_s27 = sshll.u32 %s870_s21, 1 }
  0x13   : > { %s50_s28 = sadd.s32 %s866_s20, %s523_s27  ;;  %s62_s29 = sadd.s32 1, %s854_s17 }
  0x14   : > { %s1202_s25 = smov (%p39_p0, %s38_s25), 0  ;;  %s1204_s26 = smov (!%p39_p0, %s45_s26), %s870_s21 }
  0x15   : > { %1182 = sst [smem:[#allocation16_spill]] %s1202_s25  ;;  %p51_p1 = scmp.lt.s32.totalorder %s50_s28, 2 }
  0x16   : > { %p69_p2 = scmp.ne.s32.totalorder %s854_s17, %s850_s16  ;;  %p47_p3 = scmp.ge.s32.totalorder %s1204_s26, 2 }
  0x17   : > { %p70_p4 = scmp.eq.s32.totalorder %s874_s22, 0  ;;  %s1206_s28 = smov (!%p51_p1, %s50_s28), 2 }
  0x18   : > { %s1208_s26 = smov (%p47_p3, %s1204_s26), 0  ;;  %p75_p6 = scmp.ne.s32.totalorder %s850_s16, %s846_s15 }
  0x19   : > { %1183 = sst [smem:[#allocation17_spill]] %s1208_s26  ;;  %p973_p5 = por %p70_p4, %p69_p2 }
  0x1a   : > { %s524_s4 = sshll.u32 %s1208_s26, 1  ;;  %p76_p7 = scmp.eq.s32.totalorder %s521_s23, 0 }
  0x1b   : > { %s54_s5 = sadd.s32 %s524_s4, %s1202_s25  ;;  %s121_s6 = ssub.s32 %s870_s21, %s1208_s26 }
  0x1c   : > { %p55_p8 = scmp.lt.s32.totalorder %s54_s5, 2  ;;  %p985_p9 = por %p76_p7, %p75_p6 }
  0x1d   : > { %p124_p10 = scmp.eq.s32.totalorder %s121_s6, 0  ;;  %s126_s8 = sadd.s32 1, %s842_s14 }
  0x1e   : > { %s1210_s5 = smov (!%p55_p8, %s54_s5), 2  ;;  %p136_p11 = scmp.ne.s32.totalorder %s842_s14, %s838_s13 }
  0x1f   : > { %s991_s9 = scalar_select %p124_p10, %s842_s14, %s126_s8  }
  0x20   : > { %s58_s10 = ssub.s32 %s1206_s28, %s1210_s5  ;;  %p137_p13 = scmp.eq.s32.totalorder %s521_s23, 3 }
  0x21   : > { %p60_p12 = scmp.eq.s32.totalorder %s58_s10, 0  ;;  %p142_p0 = scmp.ne.s32.totalorder %s838_s13, %s834_s12 }
  0x22   : > { %p143_p1 = scmp.eq.s32.totalorder %s522_s24, 3  ;;  %p1005_p2 = por %p137_p13, %p136_p11 }
  0x23   : > { %s1003_s11 = scalar_select %p60_p12, %s854_s17, %s62_s29  }
  0x24   : > { %p1009_p3 = por %p143_p1, %p142_p0  ;;  %p573_p4 = scmp.lt.s32.totalorder %s874_s22, 4 }
  0x25   : > { %s1015_s4 = sand.u32 1, %s854_s17   ;;  %s531_s23 = sshll.u32 %s1206_s28, 5 }
  0x26   : > { %s529_s5 = sshll.u32 %s1015_s4, 1  ;;  %s1188_s0 = sld [smem:[#allocation18_spill]] }
  0x27   : > { %s195_s29 = scalar_lea.vmem [#allocation2], %s529_s5  ;;  %p1024_p6 = pnand %p573_p4, %p973_p5 }
  0x28   : > { %s208_s10 = sshll.u32 %s195_s29, 4  ;;  %p535_p7 = scmp.ge.s32.totalorder %s874_s22, 1  ;;  %s209_s10 = int_to_ptr.vmem [resolvable:$true] %s208_s10 }
  0x29   : > { %p237_p8 = scmp.lt.s32.totalorder %s874_s22, 5  ;;  %s192_s25 = scalar_lea.sflag [#allocation3], %s1015_s4 }
  0x2a   : > { %p666_p10 = pneg %p1024_p6  ;;  %s677_s28 = scalar_lea.vmem %s209_s10, 32 }
  0x2b   : > { %p678_p11 = scmp.ne.s32.totalorder %s209_s10, %s677_s28  ;;  %s876_s6 = smov [#allocation2]  }
  0x2c   : > { %s206_s24 = scalar_lea.hbm %s1188_s0, %s531_s23  ;;  %s682_s30 = sshll.u32 %s876_s6, 4  ;;  %s683_s30 = int_to_ptr.vmem [resolvable:$false] %s682_s30 }
  0x2d   : > { %p680_p12 = pnand %p678_p11, %p666_p10  ;;  %s684_s8 = scalar_lea.vmem %s683_s30, 64 }
  0x2e   : > { %p685_p5 = scmp.lt.s32.totalorder %s209_s10, %s683_s30  ;;  %p686_p0 = scmp.lt.s32.totalorder %s684_s8, %s677_s28 }
  0x2f   : > { %p681_p13 = pneg %p680_p12 }
  0x30   : > { %p687_p1 = por %p686_p0, %p685_p5 }
  0x32   : > { %p688_p4 = pnand %p687_p1, %p681_p13 }
  0x34   : > { %691 = shalt.err (!%p688_p4)
}
  0x35   : > { %562 = dma.hbm_to_vmem [thread:$0]  (!%p1024_p6), %s206_s24, 32, %s209_s10, %s192_s25  }
  0x36   : > { %p1042_p11 = pnand %p535_p7, %p237_p8  ;;  %s230_s28 = scalar_lea.hbm %s1172_s1, %s531_s23 }
  0x37   : > { %s219_s30 = scalar_lea.vmem [#allocation5], %s529_s5  ;;  %s216_s21 = scalar_lea.sflag [#allocation6], %s1015_s4 }
  0x38   : > { %s232_s8 = sshll.u32 %s219_s30, 4  ;;  %s877_s25 = smov [#allocation5]   ;;  %s233_s8 = int_to_ptr.vmem [resolvable:$true] %s232_s8 }
  0x39   : > { %s705_s20 = scalar_lea.vmem %s233_s8, 32  ;;  %s710_s24 = sshll.u32 %s877_s25, 4  ;;  %s711_s24 = int_to_ptr.vmem [resolvable:$false] %s710_s24 }
  0x3a   : > { %p706_p12 = scmp.ne.s32.totalorder %s233_s8, %s705_s20  ;;  %s712_s10 = scalar_lea.vmem %s711_s24, 64 }
  0x3b   : > { %p713_p7 = scmp.lt.s32.totalorder %s233_s8, %s711_s24  ;;  %p714_p8 = scmp.lt.s32.totalorder %s712_s10, %s705_s20 }
  0x3c   : > { %p708_p13 = pnand %p706_p12, %p666_p10 }
  0x3d   : > { %p715_p0 = por %p714_p8, %p713_p7 }
  0x3e   : > { %p709_p5 = pneg %p708_p13 }
  0x40   : > { %p716_p1 = pnand %p715_p0, %p709_p5 }
  0x42   : > { %719 = shalt.err (!%p716_p1)
}
  0x43   : > { %565 = dma.hbm_to_vmem [thread:$0]  (!%p1024_p6), %s230_s28, 32, %s233_s8, %s216_s21  }
  0x44   : > { %241 = sbr.rel (%p1042_p11) target bundleno = 171 (0xab), region = 28  ;;  %s243_s0 = sand.u32 (!%p1042_p11), 1, %s850_s16  }
  0x45   : > { %s536_s4 = sshll.u32 (!%p1042_p11), %s243_s0, 1  ;;  %s244_s23 = scalar_lea.sflag (!%p1042_p11), [#allocation3], %s243_s0 }
  0x46   : > { %s1058_s5 = scalar_lea.vmem (!%p1042_p11), [#allocation2], %s536_s4 }
  0x49   : > { %817 = dma.done.wait (%p985_p9), %s244_s23, 32  }
  0x4a   : > { %819 = vsyncadd (%p985_p9), %s244_s23, 4294967264  ;;  %s253_s20 = scalar_lea.sflag [#allocation6], %s243_s0  ;;  %s1064_s6 = scalar_lea.vmem [#allocation5], %s536_s4 }
  0x4b   : > { %821 = dma.done.wait (%p985_p9), %s253_s20, 32  }
  0x4c   : > { %823 = vsyncadd (%p985_p9), %s253_s20, 4294967264  ;;  %s1071_s21 = sand.u32 1, %s838_s13   ;;  %p540_p6 = scmp.ne.s32.totalorder %s858_s18, 0 }
  0x4d   : > { %s538_s26 = sshll.u32 %s1071_s21, 1 }
  0x4e   : > { %s1074_s29 = scalar_lea.vmem [#allocation7], %s538_s26  ;;  %s1076_s28 = scalar_lea.vmem [#allocation8], %s538_s26 }
  0x4f   : > { %300 = sbr.rel (%p540_p6) target bundleno = 86 (0x56), region = 40 }
  0x54   : > { %v878_v0 = vmov 0.0  }
  0x55   : > { %301 = vst [vmem:[%s1074_s29] sm:$0x3] %v878_v0  ;;  %302 = vst [vmem:[%s1076_s28] sm:$0x3] %v878_v0 }
  0x56 PF: > { %s541_s7 = sshll.u32 %s862_s19, 1 }
  0x57   : > { %s304_s30 = sadd.s32 %s858_s18, %s541_s7 }
  0x58   : > { %s542_s8 = sshll.u32 %s304_s30, 7 }
  0x59   : > { %s306_s25 = sadd.s32 128, %s542_s8 }
  0x5a   : > { %p543_p9 = scmp.gt.s32.totalorder %s306_s25, 384 }
  0x5c   : > { %310 = sbr.rel (%p543_p9) target bundleno = 105 (0x69), region = 44 }
  0x61   : > { %v311_v1 = vld [vmem:[%s1058_s5] sm:$0x3]  ;;  %v315_v2 = vld [vmem:[%s1074_s29] sm:$0x3]  ;;  %v312_v3 = vld [vmem:[%s1064_s6] sm:$0x3] }
  0x62   : > { %v316_v4 = vadd.f32 %v315_v2, %v311_v1  ;;  %v313_v5 = vcvt.s32.f32 %v312_v3  ;;  %v318_v6 = vld [vmem:[%s1076_s28] sm:$0x3] }
  0x64   : > { %317 = vst [vmem:[%s1074_s29] sm:$0x3] %v316_v4  ;;  %v314_v7 = vmul.f32 %v313_v5, %v311_v1 }
  0x66   : > { %v319_v8 = vadd.f32 %v318_v6, %v314_v7 }
  0x68   : > { %320 = vst [vmem:[%s1076_s28] sm:$0x3] %v319_v8 }
  0x69 PF: > { %p544_p10 = scmp.le.s32.totalorder %s306_s25, 384 }
  0x6b   : > { %324 = sbr.rel (%p544_p10) target bundleno = 125 (0x7d), region = 48 }
  0x70   : > { %v325_v9 = vlaneseq  ;;  %v328_v10 = vld [vmem:[%s1064_s6] sm:$0x3]  ;;  %v330_v11 = vstv %s542_s8  ;;  %v327_v14 = vld [vmem:[%s1058_s5] sm:$0x3]  ;;  %v336_v16 = vld [vmem:[%s1074_s29] sm:$0x3] }
  0x71   : > { %v329_v13 = vcvt.s32.f32 %v328_v10  ;;  %v339_v19 = vld [vmem:[%s1076_s28] sm:$0x3] }
  0x72   : > { %v326_v12 = vand.u32 127, %v325_v9 }
  0x74   : > { %v331_v15 = vadd.s32 %v330_v11, %v326_v12 }
  0x76   : > { %vm332_vm0 = vcmp.lt.s32.totalorder %v331_v15, 384 }
  0x77   : > { %v333_v17 = vsel %vm332_vm0, %v327_v14, 0.0  ;;  %v334_v18 = vsel %vm332_vm0, %v329_v13, 0.0 }
  0x78   : > { %v337_v20 = vadd.f32 %v336_v16, %v333_v17  ;;  %v335_v21 = vmul.f32 %v334_v18, %v333_v17 }
  0x7a   : > { %338 = vst [vmem:[%s1074_s29] sm:$0x3] %v337_v20  ;;  %v340_v22 = vadd.f32 %v339_v19, %v335_v21 }
  0x7c   : > { %341 = vst [vmem:[%s1076_s28] sm:$0x3] %v340_v22 }
  0x7d PF: > { %s547_s18 = sshll.u32 %s862_s19, 5  ;;  %s362_s4 = sshll.u32 %s1074_s29, 4  ;;  %s363_s4 = int_to_ptr.vmem [resolvable:$true] %s362_s4 }
  0x7e   : > { %s360_s0 = scalar_lea.hbm %s1173_s2, %s547_s18  ;;  %s343_s23 = scalar_lea.sflag [#allocation4], %s1071_s21 }
  0x7f   : > { %s720_s5 = scalar_lea.vmem %s363_s4, 32  ;;  %s879_s20 = smov [#allocation7]  }
  0x80   : > { %p721_p4 = scmp.ne.s32.totalorder %s363_s4, %s720_s5  ;;  %s724_s6 = sshll.u32 %s879_s20, 4  ;;  %s725_s6 = int_to_ptr.vmem [resolvable:$false] %s724_s6 }
  0x81   : > { %s726_s26 = scalar_lea.vmem %s725_s6, 64  ;;  %p727_p13 = scmp.lt.s32.totalorder %s363_s4, %s725_s6 }
  0x82   : > { %p722_p11 = pnand %p721_p4, %p1005_p2  ;;  %p728_p5 = scmp.lt.s32.totalorder %s726_s26, %s720_s5 }
  0x84   : > { %p723_p12 = pneg %p722_p11  ;;  %p729_p7 = por %p728_p5, %p727_p13 }
  0x86   : > { %p730_p8 = pnand %p729_p7, %p723_p12 }
  0x88   : > { %733 = shalt.err (!%p730_p8)
}
  0x89   : > { %s734_s7 = scalar_lea.hbm %s360_s0, 32  ;;  %s738_s8 = scalar_lea.hbm %s1173_s2, 64 }
  0x8a   : > { %p735_p0 = scmp.ne.s32.totalorder %s360_s0, %s734_s7  ;;  %p739_p9 = scmp.lt.s32.totalorder %s360_s0, %s1173_s2 }
  0x8b   : > { %p740_p10 = scmp.lt.s32.totalorder %s738_s8, %s734_s7 }
  0x8c   : > { %p736_p1 = pnand %p735_p0, %p1005_p2 }
  0x8d   : > { %p741_p4 = por %p740_p10, %p739_p9 }
  0x8e   : > { %p737_p6 = pneg %p736_p1 }
  0x90   : > { %p742_p11 = pnand %p741_p4, %p737_p6 }
  0x92   : > { %745 = shalt.err (!%p742_p11)
}
  0x93   : > { %555 = dma.vmem_to_hbm [thread:$0]  (%p1005_p2), %s363_s4, 32, %s360_s0, %s343_s23  }
  0x94   : > { %s374_s20 = scalar_lea.hbm %s1174_s3, %s547_s18  ;;  %s376_s6 = sshll.u32 %s1076_s28, 4  ;;  %s377_s6 = int_to_ptr.vmem [resolvable:$true] %s376_s6 }
  0x95   : > { %s348_s26 = scalar_lea.sflag [#allocation9], %s1071_s21  ;;  %s746_s29 = scalar_lea.vmem %s377_s6, 32 }
  0x96   : > { %p747_p12 = scmp.ne.s32.totalorder %s377_s6, %s746_s29  ;;  %s880_s7 = smov [#allocation8]  }
  0x97   : > { %s750_s30 = sshll.u32 %s880_s7, 4  ;;  %s751_s30 = int_to_ptr.vmem [resolvable:$false] %s750_s30 }
  0x98   : > { %p748_p13 = pnand %p747_p12, %p1005_p2  ;;  %s752_s8 = scalar_lea.vmem %s751_s30, 64 }
  0x99   : > { %p753_p7 = scmp.lt.s32.totalorder %s377_s6, %s751_s30  ;;  %p754_p8 = scmp.lt.s32.totalorder %s752_s8, %s746_s29 }
  0x9a   : > { %p749_p5 = pneg %p748_p13 }
  0x9b   : > { %p755_p0 = por %p754_p8, %p753_p7 }
  0x9d   : > { %p756_p1 = pnand %p755_p0, %p749_p5 }
  0x9f   : > { %759 = shalt.err (!%p756_p1)
}
  0xa0   : > { %s760_s19 = scalar_lea.hbm %s374_s20, 32  ;;  %s764_s18 = scalar_lea.hbm %s1174_s3, 64 }
  0xa1   : > { %p761_p6 = scmp.ne.s32.totalorder %s374_s20, %s760_s19  ;;  %p765_p4 = scmp.lt.s32.totalorder %s374_s20, %s1174_s3 }
  0xa2   : > { %p766_p11 = scmp.lt.s32.totalorder %s764_s18, %s760_s19 }
  0xa3   : > { %p762_p9 = pnand %p761_p6, %p1005_p2 }
  0xa4   : > { %p767_p12 = por %p766_p11, %p765_p4 }
  0xa5   : > { %p763_p10 = pneg %p762_p9 }
  0xa7   : > { %p768_p13 = pnand %p767_p12, %p763_p10 }
  0xa9   : > { %771 = shalt.err (!%p768_p13)
}
  0xaa   : > { %556 = dma.vmem_to_hbm [thread:$0]  (%p1005_p2), %s377_s6, 32, %s374_s20, %s348_s26  }
  0xab PF: > { %p574_p5 = scmp.ge.s32.totalorder %s874_s22, 2  ;;  %s388_s23 = sand.u32 1, %s834_s12  }
  0xac   : > { %s389_s25 = scalar_lea.sflag [#allocation4], %s388_s23 }
  0xad   : > { %p567_p7 = pnand %p574_p5, %p1009_p3 }
  0xaf   : > { %p568_p8 = pneg %p567_p7 }
  0xb1   : > { %825 = dma.done.wait (%p568_p8), %s389_s25, 32  }
  0xb2   : > { %827 = vsyncadd (%p568_p8), %s389_s25, 4294967264  ;;  %s398_s24 = scalar_lea.sflag [#allocation9], %s388_s23 }
  0xb3   : > { %829 = dma.done.wait (%p568_p8), %s398_s24, 32  }
  0xb4   : > { %831 = vsyncadd (%p568_p8), %s398_s24, 4294967264  ;;  %s26_s22 = sadd.s32 1, %s874_s22   ;;  %s1191_s18 = sld [smem:[#allocation14_spill]] }
  0xb5   : > { %p23_p0 = scmp.ge.s32.totalorder %s26_s22, 6   ;;  %s1192_s19 = sld [smem:[#allocation15_spill]] }
  0xb6   : > { %s1193_s20 = sld [smem:[#allocation16_spill]]  ;;  %s1195_s12 = smov %s838_s13 }
  0xb7   : > { %s1194_s21 = sld [smem:[#allocation17_spill]]  ;;  %s1196_s13 = smov %s842_s14 }
  0xb8   : > { %s1197_s14 = smov %s991_s9  ;;  %s1198_s15 = smov %s850_s16 }
  0xb9   : > { %s1199_s16 = smov %s854_s17  ;;  %s1200_s17 = smov %s1003_s11 }
  0xba   :  { %25 = sbr.rel (!%p23_p0) target bundleno = 15 (0xf), region = 115 }
  0xbf   :  { %403 = vsyncpa [#allocation3], 1 }
  0xc0   :  { %405 = vsyncpa [#allocation3 + $0x1], 1 }
  0xc1   :  { %406 = vsyncpa [#allocation6], 1 }
  0xc2   :  { %408 = vsyncpa [#allocation6 + $0x1], 1 }
  0xc3   :  { %409 = vsyncpa [#allocation4], 1 }
  0xc4   :  { %411 = vsyncpa [#allocation4 + $0x1], 1 }
  0xc5   :  { %412 = vsyncpa [#allocation9], 1 }
  0xc6   :  { %414 = vsyncpa [#allocation9 + $0x1], 1 }

</bundles_post_ra>
